<compile_context>
chip_gen: v7x
topology: tpu7x:2x2x1
jax: 0.10.0
libtpu: 0.0.40
codegen_flags: <defaults>
</compile_context>

<pallas_src>
import functools

import jax
import jax.numpy as jnp
from jax.experimental import pallas as pl
from jax.experimental.pallas import tpu as pltpu

_LANE = 128
_SUB = 8
_TILE = _SUB * _LANE        # elements per (8, 128) f32 vreg tile
_BLOCK_G = 256              # (256, 8, 128) f32 block = 1 MiB per buffer
_FUSED_MAX_G = 2048         # slab <= 2 MiB f32 -> single fused kernel


# ---------------------------------------------------------------------------
# Fused kernel (small tensors): reduce + EMA update + rsqrt + scale in one pass.
# ---------------------------------------------------------------------------
def _fused_kernel(ema_ref, x_ref, y_ref, ema_out_ref, *, n, beta, training):
    xf = x_ref[...].astype(jnp.float32)
    ema = ema_ref[0]
    if training:
        cur = jnp.sum(xf * xf) / jnp.float32(n)
        new_ema = jnp.where(
            jnp.isnan(cur), ema, cur + jnp.float32(beta) * (ema - cur))
    else:
        new_ema = ema
    ema_out_ref[0, 0] = new_ema
    gain = jax.lax.rsqrt(new_ema + jnp.float32(1e-5))   # EUP, essentially free
    y_ref[...] = (xf * gain).astype(y_ref.dtype)


# ---------------------------------------------------------------------------
# Two-pass path, kernel 1: sum of squares with an (8,128) VMEM vector
# accumulator; one XLU cross-lane reduce only on the last grid step.
# ---------------------------------------------------------------------------
def _sumsq_kernel(x_ref, out_ref, acc_ref):
    i = pl.program_id(0)

    @pl.when(i == 0)
    def _():
        acc_ref[...] = jnp.zeros_like(acc_ref)

    xf = x_ref[...].astype(jnp.float32)          # (block_g, 8, 128)
    acc_ref[...] += jnp.sum(xf * xf, axis=0)     # VPU vector adds only

    @pl.when(i == pl.num_programs(0) - 1)
    def _():
        out_ref[0, 0] = jnp.sum(acc_ref[...])    # single cross-lane reduce

# TODO(synk): on v7x, split the reduction grid across the 2 TensorCores
# (two partial sums combined in the scalar glue) for ~2x reduction speedup.


# ---------------------------------------------------------------------------
# Two-pass path, kernel 2: elementwise scale by an SMEM scalar gain.
# ---------------------------------------------------------------------------
def _scale_kernel(gain_ref, x_ref, y_ref):
    y_ref[...] = (x_ref[...].astype(jnp.float32) * gain_ref[0]).astype(y_ref.dtype)


def _pack(x, block_g):
    """Pack x into a (G, 8, 128) slab, G % block_g == 0; pad only if needed."""
    n = x.size
    g = pl.cdiv(n, _TILE)
    g_pad = pl.cdiv(g, block_g) * block_g
    flat = x.reshape(-1)
    if g_pad * _TILE == n:                       # common case: free reshape
        return flat.reshape(g_pad, _SUB, _LANE), g_pad
    padded = jnp.zeros((g_pad * _TILE,), x.dtype).at[:n].set(flat)
    return padded.reshape(g_pad, _SUB, _LANE), g_pad


@functools.partial(jax.jit, static_argnames=("beta", "training", "fuse"))
def ema_norm_forward(x, magnitude_ema, *, beta, training=True, fuse=None):
    """Returns (y, new_magnitude_ema), matching EMANorm.forward (+ buffer update)."""
    orig_shape = x.shape
    n = int(x.size)
    isz = int(x.dtype.itemsize)
    ema_f32 = magnitude_ema.astype(jnp.float32).reshape(1)

    g = pl.cdiv(n, _TILE)
    if fuse is None:
        fuse = g <= _FUSED_MAX_G

    if fuse:
        slab, g_pad = _pack(x, 1)
        y_slab, new_ema2 = pl.pallas_call(
            functools.partial(_fused_kernel, n=n, beta=beta, training=training),
            out_shape=(jax.ShapeDtypeStruct((g_pad, _SUB, _LANE), x.dtype),
                       jax.ShapeDtypeStruct((1, 1), jnp.float32)),
            in_specs=[pl.BlockSpec(memory_space=pltpu.SMEM),   # ema scalar
                      pl.BlockSpec(memory_space=pltpu.VMEM)],  # whole slab
            out_specs=(pl.BlockSpec(memory_space=pltpu.VMEM),
                       pl.BlockSpec(memory_space=pltpu.SMEM)),
            cost_estimate=pl.CostEstimate(
                flops=3 * n, transcendentals=1,
                bytes_accessed=2 * n * isz + 8),
        )(ema_f32, slab)
        new_ema = new_ema2[0, 0]
    else:
        block_g = min(_BLOCK_G, int(g))
        slab, g_pad = _pack(x, block_g)
        grid = (g_pad // block_g,)

        # --- pass 1: sum(x^2) --------------------------------------------
        sumsq = pl.pallas_call(
            _sumsq_kernel,
            out_shape=jax.ShapeDtypeStruct((1, 1), jnp.float32),
            grid_spec=pltpu.PrefetchScalarGridSpec(
                num_scalar_prefetch=0,
                grid=grid,
                in_specs=[pl.BlockSpec((block_g, _SUB, _LANE),
                                       lambda i: (i, 0, 0))],
                out_specs=pl.BlockSpec(memory_space=pltpu.SMEM),
                scratch_shapes=[pltpu.VMEM((_SUB, _LANE), jnp.float32)]),
            compiler_params=pltpu.CompilerParams(
                dimension_semantics=("arbitrary",)),
            cost_estimate=pl.CostEstimate(
                flops=2 * n, transcendentals=0,
                bytes_accessed=n * isz + 4),
        )(slab)

        # --- scalar glue: EMA update + gain (tiny, plain JAX) -------------
        if training:
            cur = sumsq[0, 0] / jnp.float32(n)
            new_ema = jnp.where(
                jnp.isnan(cur), ema_f32[0],
                cur + jnp.float32(beta) * (ema_f32[0] - cur))
        else:
            new_ema = ema_f32[0]
        gain = jax.lax.rsqrt(new_ema + jnp.float32(1e-5))

        # --- pass 2: elementwise scale -------------------------------------
        y_slab = pl.pallas_call(
            _scale_kernel,
            out_shape=jax.ShapeDtypeStruct((g_pad, _SUB, _LANE), x.dtype),
            grid_spec=pltpu.PrefetchScalarGridSpec(
                num_scalar_prefetch=0,
                grid=grid,
                in_specs=[
                    pl.BlockSpec(memory_space=pltpu.SMEM),        # gain scalar
                    pl.BlockSpec((block_g, _SUB, _LANE),
                                 lambda i: (i, 0, 0)),            # x block
                ],
                out_specs=pl.BlockSpec((block_g, _SUB, _LANE),
                                       lambda i: (i, 0, 0))),
            compiler_params=pltpu.CompilerParams(
                dimension_semantics=("parallel",)),
            cost_estimate=pl.CostEstimate(
                flops=n, transcendentals=0,
                bytes_accessed=2 * n * isz + 4),
        )(gain.reshape(1), slab)

    y = y_slab.reshape(-1)[:n].reshape(orig_shape)
    return y, new_ema


def _reference(x, magnitude_ema, beta, training=True):
    """Pure-JAX reference mirroring the PyTorch module."""
    ema = magnitude_ema.astype(jnp.float32)
    if training:
        cur = jnp.mean(x.astype(jnp.float32) ** 2)
        ema = jnp.where(jnp.isnan(cur), ema, cur + beta * (ema - cur))
    gain = jax.lax.rsqrt(ema + 1e-5)
    return (x.astype(jnp.float32) * gain).astype(x.dtype), ema


def _check(x, ema0, beta, **kw):
    y, e = ema_norm_forward(x, ema0, beta=beta, training=True, **kw)
    y = jax.block_until_ready(y)
    e = jax.block_until_ready(e)
    y_ref, e_ref = _reference(x, ema0, beta, training=True)
    assert jnp.allclose(y, y_ref, atol=1e-5, rtol=1e-5), "output mismatch"
    assert jnp.allclose(e, e_ref, atol=1e-6, rtol=1e-5), "ema mismatch"


if __name__ == "__main__":
    key = jax.random.PRNGKey(0)
    beta = 0.995
    ema0 = jnp.ones((), dtype=jnp.float32)   # registered buffer init

    # 1) Small NCHW conv-feature tensor: fused single-kernel path, no padding.
    x1 = jax.random.normal(jax.random.fold_in(key, 1), (2, 4, 16, 16),
                           dtype=jnp.float32)
    _check(x1, ema0, beta)

    # 2) Ragged element count: exercises the padded-slab fused path.
    x2 = jax.random.normal(jax.random.fold_in(key, 2), (2, 3, 15, 17),
                           dtype=jnp.float32)
    _check(x2, ema0, beta)

    # 3) Larger tensor forced through the two-pass (reduce + scale) path.
    x3 = jax.random.normal(jax.random.fold_in(key, 3), (2, 16, 128, 128),
                           dtype=jnp.float32)
    _check(x3, ema0, beta, fuse=False)

    print("KERNEL_OK")
</pallas_src>

<mosaic_0001>
module attributes {stable_mosaic.version = 11 : i64} {
  func.func @_fused_kernel(%arg0: memref<1xf32, #tpu.memory_space<smem>>, %arg1: memref<2x8x128xf32, #tpu.memory_space<vmem>>, %arg2: memref<2x8x128xf32, #tpu.memory_space<vmem>>, %arg3: memref<1x1xf32, #tpu.memory_space<smem>>) attributes {dimension_semantics = [], scalar_prefetch = 0 : i64, scratch_operands = 0 : i64, tpu.core_type = #tpu.core_type<tc>} {
    %c0 = arith.constant 0 : index
    %c0_0 = arith.constant 0 : index
    %c0_1 = arith.constant 0 : index
    %0 = vector.load %arg1[%c0, %c0_0, %c0_1] : memref<2x8x128xf32, #tpu.memory_space<vmem>>, vector<2x8x128xf32>
    %c0_2 = arith.constant 0 : index
    %1 = memref.load %arg0[%c0_2] : memref<1xf32, #tpu.memory_space<smem>>
    %2 = arith.mulf %0, %0 : vector<2x8x128xf32>
    %3 = vector.shape_cast %2 : vector<2x8x128xf32> to vector<1x2x8x128xf32>
    %cst = arith.constant dense<0.000000e+00> : vector<1xf32>
    %4 = vector.multi_reduction <add>, %3, %cst [1, 2, 3] : vector<1x2x8x128xf32> to vector<1xf32>
    %5 = vector.shape_cast %4 : vector<1xf32> to vector<1x1x1x1xf32>
    %6 = vector.extract %5[0, 0, 0, 0] : f32 from vector<1x1x1x1xf32>
    %cst_3 = arith.constant 2.048000e+03 : f32
    %7 = arith.divf %6, %cst_3 : f32
    %8 = arith.cmpf one, %7, %7 : f32
    %9 = arith.subf %1, %7 : f32
    %cst_4 = arith.constant 9.950000e-01 : f32
    %10 = arith.mulf %cst_4, %9 : f32
    %11 = arith.addf %7, %10 : f32
    %12 = arith.select %8, %1, %11 : f32
    %c0_5 = arith.constant 0 : index
    %c0_6 = arith.constant 0 : index
    %13 = memref.load %arg3[%c0_5, %c0_6] : memref<1x1xf32, #tpu.memory_space<smem>>
    memref.store %12, %arg3[%c0_5, %c0_6] : memref<1x1xf32, #tpu.memory_space<smem>>
    %cst_7 = arith.constant 9.99999974E-6 : f32
    %14 = arith.addf %12, %cst_7 : f32
    %15 = math.rsqrt %14 : f32
    %16 = vector.broadcast %15 : f32 to vector<2x8x128xf32>
    %17 = arith.mulf %0, %16 : vector<2x8x128xf32>
    %c0_8 = arith.constant 0 : index
    %c0_9 = arith.constant 0 : index
    %c0_10 = arith.constant 0 : index
    %18 = vector.load %arg2[%c0_8, %c0_9, %c0_10] : memref<2x8x128xf32, #tpu.memory_space<vmem>>, vector<2x8x128xf32>
    tpu.vector_store %arg2[%c0_8, %c0_9, %c0_10], %17 {strides = array<i32>} : memref<2x8x128xf32, #tpu.memory_space<vmem>>, vector<2x8x128xf32>,
    return
  }
}

</mosaic_0001>

<bundles_post_ra>
// kernel: ema_norm_forward.1
= control target key start
LH: loop header
LB: loop body
LE: loop exit
PB: predicated region body
PF: predicated region fallthrough
CT: control target
= control target key end

     0   :  { %s136_s0 = inlined_call_operand.<no memory space> [shape: f32[1], index: 0, kind: input, shape index: {}]   ;;  %s137_s1 = inlined_call_operand.vmem [shape: f32[2,8,128], index: 1, kind: input, shape index: {}]   ;;  %s138_s2 = inlined_call_operand.vmem [shape: f32[2,8,128], index: 2, kind: output, shape index: {0}]   ;;  %s139_s3 = inlined_call_operand.hbm [shape: f32[1,1], index: 3, kind: output, shape index: {1}]  }
   0x1   :  { %v15_v0 = vld [vmem:[%s137_s1] sm:$0xff]  ;;  %v16_v1 = vld [vmem:[%s137_s1 + $0x8] sm:$0xff] }
   0x2   :  { %10 = vsyncpa [#allocation4], 0  ;;  %v18_v2 = vmul.f32 %v15_v0, %v15_v0  ;;  %v19_v3 = vmul.f32 %v16_v1, %v16_v1  ;;  %s73_s27 = scalar_lea.hbm %s139_s3, 16 }
   0x3   :  { %p74_p1 = scmp.ne.s32.totalorder %s139_s3, %s73_s27  ;;  %p77_p2 = scmp.lt.u32.totalorder %s73_s27, %s139_s3 }
   0x4   :  { %v20_v4 = vadd.f32 %v19_v3, %v18_v2 }
   0x5   :  { %p79_p3 = pnand %p77_p2, %p74_p1 }
   0x6   :  { %21 = vadd.xlane.f32.xlu0 %v20_v4 }
  0x93   :  { %v22_v5 = vpop.xlane.xlu0 %21 }
  0x94   :  { %v23_v6 = vrot.slane %v22_v5, 4 }
  0x96   :  { %v24_v7 = vadd.f32 %v23_v6, %v22_v5 }
  0x98   :  { %v25_v8 = vrot.slane %v24_v7, 2 }
  0x9a   :  { %v26_v9 = vadd.f32 %v25_v8, %v24_v7 }
  0x9c   :  { %v27_v10 = vrot.slane %v26_v9, 1 }
  0x9e   :  { %v28_v11 = vadd.f32 %v27_v10, %v26_v9 }
  0xa0   :  { %66 = vpush %v28_v11 }
  0xd1   :  { %s67_s16 = spop %66 }
  0xd2   :  { %s32_s17 = smul.f32 0.00048828125, %s67_s16 }
  0xd4   :  { %s34_s20 = ssub.f32 %s136_s0, %s32_s17  ;;  %p33_p0 = scmp.ne.f32.partialorder %s32_s17, %s32_s17 }
  0xd6   :  { %s35_s1 = smul.f32 0.995, %s34_s20 }
  0xd8   :  { %s36_s21 = sadd.f32 %s35_s1, %s32_s17 }
  0xda   :  { %s141_s0 = smov (!%p33_p0, %s136_s0), %s36_s21 }
  0xdb   :  { %s40_s24 = sadd.f32 1e-05, %s141_s0 }
  0xdc   :  { %39 = sst [smem:[#allocation3]] %s141_s0 }
  0xdd   :  { %v41_v12 = vstv %s40_s24 }
  0xde   :  { %82 = shalt.err (!%p79_p3)
}
  0xdf   :  { %s85_s5 = smov [#allocation3]   ;;  %71 = vrsqrt.f32 %v41_v12 }
  0xe0   :  { %58 = dma.smem_to_hbm %s85_s5, 16, %s139_s3, [#allocation4]  }
  0xe9   :  { %v72_v13 = vpop.eup %71 }
  0xea   :  { %68 = vpush %v72_v13 }
 0x11b   :  { %s69_s0 = spop %68 }
 0x11c   :  { %v44_v14 = vstv %s69_s0 }
 0x11d   :  { %v45_v15 = vmul.f32 %v44_v14, %v15_v0  ;;  %v46_v16 = vmul.f32 %v44_v14, %v16_v1 }
 0x11f   :  { %47 = vst [vmem:[%s138_s2] sm:$0xff] %v45_v15  ;;  %48 = vst [vmem:[%s138_s2 + $0x8] sm:$0xff] %v46_v16 }
 0x120   :  { %83 = dma.done.wait [#allocation4], 16  }
 0x121   :  { %84 = vsyncadd [#allocation4], 4294967280 }
 0x122   :  { %64 = sfence }
 0x123   :  { %65 = vsyncpa [#allocation4], 1 }

</bundles_post_ra>
